<compile_context>
chip_gen: v7x
topology: tpu7x:2x2x1
jax: 0.10.0
libtpu: 0.0.40
codegen_flags: <defaults>
</compile_context>

<pallas_src>
import functools

import jax
import jax.numpy as jnp
from jax.experimental import pallas as pl
from jax.experimental.pallas import tpu as pltpu


def _round_up(x, m):
    return ((x + m - 1) // m) * m


def _gelu(x, approximate):
    if approximate:
        # tanh-approx: transcendental goes to the EUP slot (near-free vs VALU).
        return jax.nn.gelu(x, approximate=True)
    # Matches torch.nn.functional.gelu default (erf-based).
    return 0.5 * x * (1.0 + jax.lax.erf(x * 0.7071067811865476))


def _vmem_budgets():
    """(vmem_limit_bytes to pass to Mosaic, byte budget for our own tiles)."""
    try:
        cap = pltpu.get_tpu_info().vmem_capacity_bytes
    except Exception:
        cap = 64 * 1024 * 1024  # conservative (v7x per-core size)
    # ~70% as the scoped limit (headroom for Mosaic internal scratch),
    # ~60% as the budget for our double-buffered blocks + accumulator.
    return int(cap * 0.70), int(cap * 0.60)


def _tile_footprint_bytes(tm, th, in_p, out_p, cbytes):
    """Double-buffered block bytes + f32 accumulator for one grid step."""
    blocks = (tm * in_p + in_p * th + th * out_p + tm * out_p) * cbytes
    blocks += (th + out_p) * 4  # biases kept in f32 (tiny)
    return 2 * blocks + tm * out_p * 4


def _mlp_kernel(x_ref, w1_ref, b1_ref, w2_ref, b2_ref, o_ref, acc_ref,
                *, approximate_gelu):
    # Grid: (row tiles, hidden tiles).  Hidden axis is the reduction axis.
    # x_ref:  (tm, in_p)   compute dtype
    # w1_ref: (in_p, th)   compute dtype     b1_ref: (1, th)    f32
    # w2_ref: (th, out_p)  compute dtype     b2_ref: (1, out_p) f32
    # o_ref:  (tm, out_p)  output dtype      acc_ref: (tm, out_p) f32 scratch
    k = pl.program_id(1)

    @pl.when(k == 0)
    def _():
        # Fold bias2 into the accumulator init (saves an epilogue add).
        acc_ref[...] = b2_ref[...] + jnp.zeros_like(acc_ref)

    # fc1 for this hidden slice (MXU, f32 accumulation), + bias, + GELU.
    h = jnp.dot(x_ref[...], w1_ref[...], preferred_element_type=jnp.float32)
    h = h + b1_ref[...]
    h = _gelu(h, approximate_gelu)
    # dropout -> identity (eval mode)

    # fc2 partial product over this hidden slice, accumulate in f32.
    acc_ref[...] += jnp.dot(h.astype(w2_ref.dtype), w2_ref[...],
                            preferred_element_type=jnp.float32)

    @pl.when(k == pl.num_programs(1) - 1)
    def _():
        y = _gelu(acc_ref[...], approximate_gelu)
        # dropout -> identity (eval mode)
        o_ref[...] = y.astype(o_ref.dtype)


def _pad2(a, rows, cols):
    pr, pc = rows - a.shape[0], cols - a.shape[1]
    if pr == 0 and pc == 0:
        return a
    return jnp.pad(a, ((0, pr), (0, pc)))


def prepare_mlp_params(w1, b1, w2, b2, *, compute_dtype=jnp.bfloat16, th=None):
    """Pad + cast the weights ONCE (cache and reuse across forward calls).

    Picks the hidden tile th here so the hidden dim can be padded up to a
    multiple of th (never shrinking th).  th == padded hidden means the weight
    block indices are constant over the grid -> weights fetched from HBM once.
    """
    in_dim, hidden = w1.shape
    out_dim = w2.shape[1]
    in_p = _round_up(in_dim, 128)
    out_p = _round_up(out_dim, 128)
    hid_128 = _round_up(hidden, 128)
    cbytes = jnp.dtype(compute_dtype).itemsize
    _, tile_budget = _vmem_budgets()

    if th is None:
        # Prefer weight-resident (grid_k == 1); checked with a modest tm=128 so
        # the row tile can still be raised at call time.
        if _tile_footprint_bytes(128, hid_128, in_p, out_p, cbytes) <= tile_budget:
            th = hid_128
        else:
            th = 256
            for cand in (1024, 512, 256):
                if cand <= hid_128 and _tile_footprint_bytes(
                        128, cand, in_p, out_p, cbytes) <= tile_budget:
                    th = cand
                    break
            else:
                th = 128
    th = max(128, (th // 128) * 128)
    hid_p = _round_up(hid_128, th)

    w1p = _pad2(w1, in_p, hid_p).astype(compute_dtype)
    b1p = _pad2(b1.reshape(1, hidden), 1, hid_p).astype(jnp.float32)
    w2p = _pad2(w2, hid_p, out_p).astype(compute_dtype)
    b2p = _pad2(b2.reshape(1, out_dim), 1, out_p).astype(jnp.float32)

    return dict(w1=w1p, b1=b1p, w2=w2p, b2=b2p, th=th,
                in_dim=in_dim, out_dim=out_dim,
                in_p=in_p, hid_p=hid_p, out_p=out_p,
                compute_dtype=compute_dtype)


def mlp_forward(x, params, *, tm=None, approximate_gelu=False):
    """x: (B, N, in_dim) -> (B, N, out_dim) with pre-prepared padded params."""
    B, N, in_dim = x.shape
    assert in_dim == params["in_dim"]
    in_p, hid_p, out_p = params["in_p"], params["hid_p"], params["out_p"]
    out_dim, th = params["out_dim"], params["th"]
    cdtype = params["compute_dtype"]
    cbytes = jnp.dtype(cdtype).itemsize
    M = B * N
    M8 = _round_up(M, 8)

    vmem_limit, tile_budget = _vmem_budgets()

    # Largest row tile (preferring 256-multiples for full MXU tiles) that fits
    # the per-generation VMEM budget with double buffering.
    if tm is None:
        tm = 8
        for cand in (512, 384, 256, 128, 64, 32, 16, 8):
            if cand <= M8 and _tile_footprint_bytes(
                    cand, th, in_p, out_p, cbytes) <= tile_budget:
                tm = cand
                break
    tm = max(8, (min(tm, M8) // 8) * 8)
    M_p = _round_up(M, tm)

    # Row-pad + lane-pad x, cast to compute dtype (no-ops when already aligned).
    x2 = _pad2(x.reshape(M, in_dim), M_p, in_p).astype(cdtype)

    grid = (M_p // tm, hid_p // th)

    kernel = functools.partial(_mlp_kernel, approximate_gelu=approximate_gelu)

    out2 = pl.pallas_call(
        kernel,
        out_shape=jax.ShapeDtypeStruct((M_p, out_p), x.dtype),
        grid_spec=pltpu.PrefetchScalarGridSpec(
            num_scalar_prefetch=0,
            grid=grid,
            in_specs=[
                pl.BlockSpec((tm, in_p), lambda i, k: (i, 0)),    # x rows
                pl.BlockSpec((in_p, th), lambda i, k: (0, k)),    # w1 hidden slice
                pl.BlockSpec((1, th), lambda i, k: (0, k)),       # b1 hidden slice
                pl.BlockSpec((th, out_p), lambda i, k: (k, 0)),   # w2 hidden slice
                pl.BlockSpec((1, out_p), lambda i, k: (0, 0)),    # b2
            ],
            out_specs=pl.BlockSpec((tm, out_p), lambda i, k: (i, 0)),
            scratch_shapes=[pltpu.VMEM((tm, out_p), jnp.float32)],
        ),
        compiler_params=pltpu.CompilerParams(
            dimension_semantics=("parallel", "arbitrary"),
            vmem_limit_bytes=vmem_limit,
        ),
    )(x2, params["w1"], params["b1"], params["w2"], params["b2"])

    return out2[:M, :out_dim].reshape(B, N, out_dim)


def _reference(x, w1, b1, w2, b2):
    h = jax.nn.gelu(x @ w1 + b1, approximate=False)
    y = jax.nn.gelu(h @ w2 + b2, approximate=False)
    return y


if __name__ == "__main__":
    key = jax.random.PRNGKey(0)
    # Small but non-trivial shapes: exercises lane padding (48 -> 128), the
    # weight-resident auto path, and (in the second run) forced row/hidden
    # tiling with the f32 accumulator reduction.
    B, N = 2, 64
    in_dim, hidden_dim, out_dim = 48, 256, 48

    k_x, k_w1, k_b1, k_w2, k_b2 = jax.random.split(key, 5)
    x = jax.random.normal(k_x, (B, N, in_dim), dtype=jnp.float32)

    # Deterministic synthetic parameters (PyTorch-like uniform init ranges).
    lim1 = 1.0 / jnp.sqrt(in_dim)
    lim2 = 1.0 / jnp.sqrt(hidden_dim)
    w1 = jax.random.uniform(k_w1, (in_dim, hidden_dim), minval=-lim1, maxval=lim1,
                            dtype=jnp.float32)
    b1 = jax.random.uniform(k_b1, (hidden_dim,), minval=-lim1, maxval=lim1,
                            dtype=jnp.float32)
    w2 = jax.random.uniform(k_w2, (hidden_dim, out_dim), minval=-lim2, maxval=lim2,
                            dtype=jnp.float32)
    b2 = jax.random.uniform(k_b2, (out_dim,), minval=-lim2, maxval=lim2,
                            dtype=jnp.float32)

    ref = _reference(x, w1, b1, w2, b2)

    # 1) f32 compute, auto tiles (weight-resident, grid_k == 1): tight tolerance.
    p_f32 = prepare_mlp_params(w1, b1, w2, b2, compute_dtype=jnp.float32)
    out_f32 = jax.block_until_ready(mlp_forward(x, p_f32))
    assert out_f32.shape == (B, N, out_dim)
    assert jnp.allclose(out_f32, ref, atol=1e-4, rtol=1e-4), "f32 mismatch vs reference"

    # 2) bf16 MXU path (default) with forced small tiles so the grid is (2, 2)
    #    and the hidden-axis accumulator / pl.when init-finalize is exercised.
    p_bf16 = prepare_mlp_params(w1, b1, w2, b2, compute_dtype=jnp.bfloat16, th=128)
    out_bf16 = jax.block_until_ready(mlp_forward(x, p_bf16, tm=64))
    assert out_bf16.shape == (B, N, out_dim)
    assert jnp.allclose(out_bf16, ref, atol=2e-2, rtol=2e-2), "bf16 mismatch vs reference"

    print("KERNEL_OK")
</pallas_src>

<mosaic_0001>
module attributes {stable_mosaic.version = 11 : i64} {
  func.func @_mlp_kernel(%arg0: i32, %arg1: i32, %arg2: memref<128x128xf32, #tpu.memory_space<vmem>>, %arg3: memref<128x256xf32, #tpu.memory_space<vmem>>, %arg4: memref<1x256xf32, #tpu.memory_space<vmem>>, %arg5: memref<256x128xf32, #tpu.memory_space<vmem>>, %arg6: memref<1x128xf32, #tpu.memory_space<vmem>>, %arg7: memref<128x128xf32, #tpu.memory_space<vmem>>, %arg8: memref<128x128xf32, #tpu.memory_space<vmem>>) attributes {dimension_semantics = [#tpu.dimension_semantics<parallel>, #tpu.dimension_semantics<arbitrary>], iteration_bounds = array<i64: 1, 1>, scalar_prefetch = 0 : i64, scratch_operands = 1 : i64, tpu.core_type = #tpu.core_type<tc>, window_params = [{transform_indices = @transform_0, window_bounds = array<i64: 128, 128>}, {transform_indices = @transform_1, window_bounds = array<i64: 128, 256>}, {transform_indices = @transform_2, window_bounds = array<i64: 1, 256>}, {transform_indices = @transform_3, window_bounds = array<i64: 256, 128>}, {pipeline_mode = #tpu.pipeline_mode<synchronous>, transform_indices = @transform_4, window_bounds = array<i64: 1, 128>}, {transform_indices = @transform_5, window_bounds = array<i64: 128, 128>}]} {
    %c0_i32 = arith.constant 0 : i32
    %0 = arith.cmpi eq, %arg1, %c0_i32 : i32
    %1 = arith.extui %0 : i1 to i32
    %c0_i32_0 = arith.constant 0 : i32
    %2 = arith.cmpi ne, %1, %c0_i32_0 : i32
    scf.if %2 {
      %c0_18 = arith.constant 0 : index
      %c0_19 = arith.constant 0 : index
      %25 = vector.load %arg6[%c0_18, %c0_19] : memref<1x128xf32, #tpu.memory_space<vmem>>, vector<1x128xf32>
      %cst_20 = arith.constant 0.000000e+00 : f32
      %26 = vector.broadcast %cst_20 : f32 to vector<128x128xf32>
      %27 = vector.broadcast %25 : vector<1x128xf32> to vector<128x128xf32>
      %28 = arith.addf %27, %26 : vector<128x128xf32>
      %c0_21 = arith.constant 0 : index
      %c0_22 = arith.constant 0 : index
      %29 = vector.load %arg8[%c0_21, %c0_22] : memref<128x128xf32, #tpu.memory_space<vmem>>, vector<128x128xf32>
      tpu.vector_store %arg8[%c0_21, %c0_22], %28 {strides = array<i32>} : memref<128x128xf32, #tpu.memory_space<vmem>>, vector<128x128xf32>,
    } else {
    }
    %c0 = arith.constant 0 : index
    %c0_1 = arith.constant 0 : index
    %3 = vector.load %arg2[%c0, %c0_1] : memref<128x128xf32, #tpu.memory_space<vmem>>, vector<128x128xf32>
    %c0_2 = arith.constant 0 : index
    %c0_3 = arith.constant 0 : index
    %4 = vector.load %arg3[%c0_2, %c0_3] : memref<128x256xf32, #tpu.memory_space<vmem>>, vector<128x256xf32>
    %cst = arith.constant dense<0.000000e+00> : vector<128x256xf32>
    %5 = tpu.matmul %3, %4, %cst {dimension_numbers = #tpu.dot_dimension_numbers<[1], [0], [0], [1], [0, 0, 1, 1], [], []>} : vector<128x128xf32>, vector<128x256xf32>, vector<128x256xf32> -> vector<128x256xf32>
    %c0_4 = arith.constant 0 : index
    %c0_5 = arith.constant 0 : index
    %6 = vector.load %arg4[%c0_4, %c0_5] : memref<1x256xf32, #tpu.memory_space<vmem>>, vector<1x256xf32>
    %7 = vector.broadcast %6 : vector<1x256xf32> to vector<128x256xf32>
    %8 = arith.addf %5, %7 : vector<128x256xf32>
    %cst_6 = arith.constant 5.000000e-01 : f32
    %9 = vector.broadcast %cst_6 : f32 to vector<128x256xf32>
    %10 = arith.mulf %9, %8 : vector<128x256xf32>
    %cst_7 = arith.constant 0.707106769 : f32
    %11 = vector.broadcast %cst_7 : f32 to vector<128x256xf32>
    %12 = arith.mulf %8, %11 : vector<128x256xf32>
    %13 = math.erf %12 : vector<128x256xf32>
    %cst_8 = arith.constant 1.000000e+00 : f32
    %14 = vector.broadcast %cst_8 : f32 to vector<128x256xf32>
    %15 = arith.addf %14, %13 : vector<128x256xf32>
    %16 = arith.mulf %10, %15 : vector<128x256xf32>
    %c0_9 = arith.constant 0 : index
    %c0_10 = arith.constant 0 : index
    %17 = vector.load %arg8[%c0_9, %c0_10] : memref<128x128xf32, #tpu.memory_space<vmem>>, vector<128x128xf32>
    %c0_11 = arith.constant 0 : index
    %c0_12 = arith.constant 0 : index
    %18 = vector.load %arg5[%c0_11, %c0_12] : memref<256x128xf32, #tpu.memory_space<vmem>>, vector<256x128xf32>
    %cst_13 = arith.constant dense<0.000000e+00> : vector<128x128xf32>
    %19 = tpu.matmul %16, %18, %cst_13 {dimension_numbers = #tpu.dot_dimension_numbers<[1], [0], [0], [1], [0, 0, 1, 1], [], []>} : vector<128x256xf32>, vector<256x128xf32>, vector<128x128xf32> -> vector<128x128xf32>
    %20 = arith.addf %17, %19 : vector<128x128xf32>
    %c0_14 = arith.constant 0 : index
    %c0_15 = arith.constant 0 : index
    %21 = vector.load %arg8[%c0_14, %c0_15] : memref<128x128xf32, #tpu.memory_space<vmem>>, vector<128x128xf32>
    tpu.vector_store %arg8[%c0_14, %c0_15], %20 {strides = array<i32>} : memref<128x128xf32, #tpu.memory_space<vmem>>, vector<128x128xf32>,
    %c0_i32_16 = arith.constant 0 : i32
    %22 = arith.cmpi eq, %arg1, %c0_i32_16 : i32
    %23 = arith.extui %22 : i1 to i32
    %c0_i32_17 = arith.constant 0 : i32
    %24 = arith.cmpi ne, %23, %c0_i32_17 : i32
    scf.if %24 {
      %c0_18 = arith.constant 0 : index
      %c0_19 = arith.constant 0 : index
      %25 = vector.load %arg8[%c0_18, %c0_19] : memref<128x128xf32, #tpu.memory_space<vmem>>, vector<128x128xf32>
      %cst_20 = arith.constant 5.000000e-01 : f32
      %26 = vector.broadcast %cst_20 : f32 to vector<128x128xf32>
      %27 = arith.mulf %26, %25 : vector<128x128xf32>
      %cst_21 = arith.constant 0.707106769 : f32
      %28 = vector.broadcast %cst_21 : f32 to vector<128x128xf32>
      %29 = arith.mulf %25, %28 : vector<128x128xf32>
      %30 = math.erf %29 : vector<128x128xf32>
      %cst_22 = arith.constant 1.000000e+00 : f32
      %31 = vector.broadcast %cst_22 : f32 to vector<128x128xf32>
      %32 = arith.addf %31, %30 : vector<128x128xf32>
      %33 = arith.mulf %27, %32 : vector<128x128xf32>
      %c0_23 = arith.constant 0 : index
      %c0_24 = arith.constant 0 : index
      %34 = vector.load %arg7[%c0_23, %c0_24] : memref<128x128xf32, #tpu.memory_space<vmem>>, vector<128x128xf32>
      tpu.vector_store %arg7[%c0_23, %c0_24], %33 {strides = array<i32>} : memref<128x128xf32, #tpu.memory_space<vmem>>, vector<128x128xf32>,
    } else {
    }
    return
  }
  func.func @transform_0(%arg0: i32, %arg1: i32) -> (i32, i32) {
    %c0_i32 = arith.constant 0 : i32
    %c0_i32_0 = arith.constant 0 : i32
    return %arg0, %c0_i32 : i32, i32
  }
  func.func @transform_1(%arg0: i32, %arg1: i32) -> (i32, i32) {
    %c0_i32 = arith.constant 0 : i32
    %c0_i32_0 = arith.constant 0 : i32
    return %c0_i32, %arg1 : i32, i32
  }
  func.func @transform_2(%arg0: i32, %arg1: i32) -> (i32, i32) {
    %c0_i32 = arith.constant 0 : i32
    %c0_i32_0 = arith.constant 0 : i32
    return %c0_i32, %arg1 : i32, i32
  }
  func.func @transform_3(%arg0: i32, %arg1: i32) -> (i32, i32) {
    %c0_i32 = arith.constant 0 : i32
    %c0_i32_0 = arith.constant 0 : i32
    return %arg1, %c0_i32 : i32, i32
  }
  func.func @transform_4(%arg0: i32, %arg1: i32) -> (i32, i32) {
    %c0_i32 = arith.constant 0 : i32
    %c0_i32_0 = arith.constant 0 : i32
    %c0_i32_1 = arith.constant 0 : i32
    return %c0_i32, %c0_i32_0 : i32, i32
  }
  func.func @transform_5(%arg0: i32, %arg1: i32) -> (i32, i32) {
    %c0_i32 = arith.constant 0 : i32
    %c0_i32_0 = arith.constant 0 : i32
    return %arg0, %c0_i32 : i32, i32
  }
}

</mosaic_0001>

<bundles_post_ra>
// kernel: tpu_custom_call.1
= control target key start
LH: loop header
LB: loop body
LE: loop exit
PB: predicated region body
PF: predicated region fallthrough
CT: control target
= control target key end

     0   :  { %10 = vsyncpa [#allocation4], 0  ;;  %s1425_s0 = inlined_call_operand.hbm [shape: f32[128,128], index: 0, kind: input, shape index: {}]   ;;  %s1426_s1 = inlined_call_operand.hbm [shape: f32[128,256], index: 1, kind: input, shape index: {}]   ;;  %s1427_s2 = inlined_call_operand.vmem [shape: f32[1,256], index: 2, kind: input, shape index: {}]   ;;  %s1428_s3 = inlined_call_operand.hbm [shape: f32[256,128], index: 3, kind: input, shape index: {}]   ;;  %s1429_s4 = inlined_call_operand.vmem [shape: f32[1,128], index: 4, kind: input, shape index: {}]   ;;  %s1430_s5 = inlined_call_operand.hbm [shape: f32[128,128], index: 5, kind: output, shape index: {}]  }
   0x1   :  { %11 = vsyncpa [#allocation7], 0 }
   0x2   :  { %12 = vsyncpa [#allocation5], 0  ;;  %s1173_s18 = smov [#allocation6]   ;;  %s1079_s22 = scalar_lea.hbm %s1426_s1, 4096 }
   0x3   :  { %s30_s19 = sshll.u32 %s1173_s18, 4  ;;  %p1080_p0 = scmp.ne.s32.totalorder %s1426_s1, %s1079_s22  ;;  %s31_s19 = int_to_ptr.vmem [resolvable:$true] %s30_s19 }
   0x4   :  { %p1083_p1 = scmp.lt.u32.totalorder %s1079_s22, %s1426_s1 }
   0x6   :  { %p1085_p2 = pnand %p1083_p1, %p1080_p0 }
   0x8   :  { %1088 = shalt.err (!%p1085_p2)
}
   0x9   :  { %s1089_s27 = scalar_lea.vmem %s31_s19, 4096  ;;  %p1094_p4 = scmp.lt.s32.totalorder %s31_s19, %s31_s19 }
   0xa   :  { %p1090_p3 = scmp.ne.s32.totalorder %s31_s19, %s1089_s27  ;;  %p1095_p5 = scmp.lt.s32.totalorder %s1089_s27, %s1089_s27 }
   0xc   :  { %p1096_p6 = por %p1095_p5, %p1094_p4 }
   0xe   :  { %p1097_p7 = pnand %p1096_p6, %p1090_p3 }
  0x10   :  { %1100 = shalt.err (!%p1097_p7)
}
  0x11   :  { %s1174_s28 = smov 256   ;;  %s1175_s29 = smov 16  }
  0x12   :  { %36 = dma.hbm_to_vmem [thread:$0]  %s1426_s1, 4096, %s31_s19, [#allocation7], %s1174_s28, %s1174_s28, %s1175_s29  }
  0x13   :  { %s1176_s7 = smov [#allocation3]   ;;  %s1101_s11 = scalar_lea.hbm %s1425_s0, 2048 }
  0x14   :  { %s18_s8 = sshll.u32 %s1176_s7, 4  ;;  %p1102_p8 = scmp.ne.s32.totalorder %s1425_s0, %s1101_s11  ;;  %s19_s8 = int_to_ptr.vmem [resolvable:$true] %s18_s8 }
  0x15   :  { %p1105_p9 = scmp.lt.u32.totalorder %s1101_s11, %s1425_s0 }
  0x17   :  { %p1107_p10 = pnand %p1105_p9, %p1102_p8 }
  0x19   :  { %1110 = shalt.err (!%p1107_p10)
}
  0x1a   :  { %s1111_s16 = scalar_lea.vmem %s19_s8, 2048  ;;  %p1116_p12 = scmp.lt.s32.totalorder %s19_s8, %s19_s8 }
  0x1b   :  { %p1112_p11 = scmp.ne.s32.totalorder %s19_s8, %s1111_s16  ;;  %p1117_p13 = scmp.lt.s32.totalorder %s1111_s16, %s1111_s16 }
  0x1d   :  { %p1118_p0 = por %p1117_p13, %p1116_p12 }
  0x1f   :  { %p1119_p1 = pnand %p1118_p0, %p1112_p11 }
  0x21   :  { %1122 = shalt.err (!%p1119_p1)
}
  0x22   :  { %s1177_s1 = smov 128   ;;  %s1178_s17 = smov 8  }
  0x23   :  { %24 = dma.hbm_to_vmem [thread:$0]  %s1425_s0, 2048, %s19_s8, [#allocation4], %s1177_s1, %s1177_s1, %s1178_s17  }
  0x24   :  { %s1179_s20 = smov [#allocation8]   ;;  %s1123_s24 = scalar_lea.hbm %s1428_s3, 4096 }
  0x25   :  { %s44_s21 = sshll.u32 %s1179_s20, 4  ;;  %p1124_p2 = scmp.ne.s32.totalorder %s1428_s3, %s1123_s24  ;;  %s45_s21 = int_to_ptr.vmem [resolvable:$true] %s44_s21 }
  0x26   :  { %p1127_p3 = scmp.lt.u32.totalorder %s1123_s24, %s1428_s3 }
  0x28   :  { %p1129_p4 = pnand %p1127_p3, %p1124_p2 }
  0x2a   :  { %1132 = shalt.err (!%p1129_p4)
}
  0x2b   :  { %s1133_s29 = scalar_lea.vmem %s45_s21, 4096  ;;  %p1138_p6 = scmp.lt.s32.totalorder %s45_s21, %s45_s21 }
  0x2c   :  { %p1134_p5 = scmp.ne.s32.totalorder %s45_s21, %s1133_s29  ;;  %p1139_p7 = scmp.lt.s32.totalorder %s1133_s29, %s1133_s29 }
  0x2e   :  { %p1140_p8 = por %p1139_p7, %p1138_p6 }
  0x30   :  { %p1141_p9 = pnand %p1140_p8, %p1134_p5 }
  0x32   :  { %1144 = shalt.err (!%p1141_p9)
}
  0x33   :  { %50 = dma.hbm_to_vmem [thread:$0]  %s1428_s3, 4096, %s45_s21, [#allocation7], %s1177_s1, %s1177_s1, %s1178_s17  }
  0x34   :  { %1167 = dma.done.wait [#allocation4], 2048  }
  0x35   :  { %1168 = vsyncadd [#allocation4], 4294965248 }
  0x36   :  { %1169 = dma.done.wait [#allocation7], 8192  }
  0x37   :  { %1170 = vsyncadd [#allocation7], 4294959104  ;;  %v1180_v0 = vmov 0.0   ;;  %v107_v1 = vld [vmem:[#allocation6 + $0x8] sm:$0xff]  ;;  %v109_v2 = vld [vmem:[#allocation6 + $0x18] sm:$0xff] }
  0x38   :  { %214 = vmatprep.mubr.f32.mxu0 %v1180_v0  ;;  %v106_v3 = vld [vmem:[#allocation6] sm:$0xff]  ;;  %v910_v4 = vpack.c.bf16 %v109_v2, %v107_v1  ;;  %v108_v5 = vld [vmem:[#allocation6 + $0x10] sm:$0xff]  ;;  %v111_v6 = vld [vmem:[#allocation6 + $0x28] sm:$0xff] }
  0x39   :  { %v113_v7 = vld [vmem:[#allocation6 + $0x38] sm:$0xff]  ;;  %v912_v8 = vpack.c.bf16 %v108_v5, %v106_v3  ;;  %v110_v10 = vld [vmem:[#allocation6 + $0x20] sm:$0xff]  ;;  %v112_v11 = vld [vmem:[#allocation6 + $0x30] sm:$0xff] }
  0x3a   :  { %v914_v9 = vpack.c.bf16 %v113_v7, %v111_v6  ;;  %v115_v12 = vld [vmem:[#allocation6 + $0x48] sm:$0xff]  ;;  %911 = vmatprep.subr.bf16.mxu0 %v910_v4  ;;  %v117_v13 = vld [vmem:[#allocation6 + $0x58] sm:$0xff]  ;;  %v916_v14 = vpack.c.bf16 %v112_v11, %v110_v10  ;;  %v114_v16 = vld [vmem:[#allocation6 + $0x40] sm:$0xff] }
  0x3b   :  { %913 = vmatpush1.bf16.msra.mxu0 %v912_v8  ;;  %v918_v15 = vpack.c.bf16 %v117_v13, %v115_v12  ;;  %v116_v17 = vld [vmem:[#allocation6 + $0x50] sm:$0xff]  ;;  %v119_v18 = vld [vmem:[#allocation6 + $0x68] sm:$0xff]  ;;  %v121_v19 = vld [vmem:[#allocation6 + $0x78] sm:$0xff] }
  0x3c   :  { %915 = vmatprep.subr.bf16.mxu0 %v914_v9  ;;  %v920_v20 = vpack.c.bf16 %v116_v17, %v114_v16  ;;  %v922_v21 = vpack.c.bf16 %v121_v19, %v119_v18  ;;  %v118_v22 = vld [vmem:[#allocation6 + $0x60] sm:$0xff]  ;;  %v120_v23 = vld [vmem:[#allocation6 + $0x70] sm:$0xff]  ;;  %v123_v24 = vld [vmem:[#allocation6 + $0x88] sm:$0xff] }
  0x3d   :  { %v125_v25 = vld [vmem:[#allocation6 + $0x98] sm:$0xff]  ;;  %v924_v26 = vpack.c.bf16 %v120_v23, %v118_v22  ;;  %v122_v28 = vld [vmem:[#allocation6 + $0x80] sm:$0xff]  ;;  %v124_v29 = vld [vmem:[#allocation6 + $0x90] sm:$0xff] }
  0x3e   :  { %v926_v27 = vpack.c.bf16 %v125_v25, %v123_v24  ;;  %v127_v30 = vld [vmem:[#allocation6 + $0xa8] sm:$0xff]  ;;  %v129_v31 = vld [vmem:[#allocation6 + $0xb8] sm:$0xff]  ;;  %v126_v32 = vld [vmem:[#allocation6 + $0xa0] sm:$0xff]  ;;  %v928_v34 = vpack.c.bf16 %v124_v29, %v122_v28 }
  0x3f   :  { %917 = vmatpush1.bf16.msra.mxu0 %v916_v14  ;;  %v128_v33 = vld [vmem:[#allocation6 + $0xb0] sm:$0xff]  ;;  %v131_v35 = vld [vmem:[#allocation6 + $0xc8] sm:$0xff]  ;;  %v133_v36 = vld [vmem:[#allocation6 + $0xd8] sm:$0xff]  ;;  %v930_v40 = vpack.c.bf16 %v129_v31, %v127_v30 }
  0x40   :  { %919 = vmatprep.subr.bf16.mxu0 %v918_v15  ;;  %v503_v37 = vld [vmem:[#allocation8 + $0x80] sm:$0xff]  ;;  %v504_v38 = vld [vmem:[#allocation8 + $0x88] sm:$0xff]  ;;  %v505_v43 = vld [vmem:[#allocation8 + $0x90] sm:$0xff]  ;;  %v932_v51 = vpack.c.bf16 %v128_v33, %v126_v32  ;;  %v934_v54 = vpack.c.bf16 %v133_v36, %v131_v35 }
  0x41   :  { %v487_v39 = vld [vmem:[#allocation8] sm:$0xff]  ;;  %v942_v41 = vpack.c.bf16 %v504_v38, %v503_v37  ;;  %v488_v42 = vld [vmem:[#allocation8 + $0x8] sm:$0xff]  ;;  %v506_v44 = vld [vmem:[#allocation8 + $0x98] sm:$0xff] }
  0x42   :  { %v944_v45 = vpack.c.bf16 %v488_v42, %v487_v39  ;;  %v946_v46 = vpack.c.bf16 %v506_v44, %v505_v43  ;;  %v489_v47 = vld [vmem:[#allocation8 + $0x10] sm:$0xff]  ;;  %v490_v48 = vld [vmem:[#allocation8 + $0x18] sm:$0xff]  ;;  %v507_v49 = vld [vmem:[#allocation8 + $0xa0] sm:$0xff] }
  0x43   :  { %921 = vmatpush1.bf16.msra.mxu0 %v920_v20  ;;  %943 = vmatprep.subr.bf16.mxu1 %v942_v41  ;;  %v508_v50 = vld [vmem:[#allocation8 + $0xa8] sm:$0xff]  ;;  %v130_v52 = vld [vmem:[#allocation6 + $0xc0] sm:$0xff]  ;;  %v948_v53 = vpack.c.bf16 %v490_v48, %v489_v47  ;;  %v132_v55 = vld [vmem:[#allocation6 + $0xd0] sm:$0xff] }
  0x44   :  { %923 = vmatprep.subr.bf16.mxu0 %v922_v21  ;;  %945 = vmatpush3.bf16.msra.mxu1 %v944_v45  ;;  %v950_v56 = vpack.c.bf16 %v508_v50, %v507_v49  ;;  %v491_v57 = vld [vmem:[#allocation8 + $0x20] sm:$0xff]  ;;  %v492_v58 = vld [vmem:[#allocation8 + $0x28] sm:$0xff]  ;;  %v137_v60 = vld [vmem:[#allocation6 + $0xf8] sm:$0xff]  ;;  %v936_v61 = vpack.c.bf16 %v132_v55, %v130_v52  ;;  %v140_v49 = vlaneseq }
  0x45   :  { %947 = vmatprep.subr.bf16.mxu1 %v946_v46  ;;  %v135_v59 = vld [vmem:[#allocation6 + $0xe8] sm:$0xff]  ;;  %v952_v62 = vpack.c.bf16 %v492_v58, %v491_v57  ;;  %v134_v1 = vld [vmem:[#allocation6 + $0xe0] sm:$0xff]  ;;  %v136_v2 = vld [vmem:[#allocation6 + $0xf0] sm:$0xff] }
  0x46   :  { %v938_v63 = vpack.c.bf16 %v137_v60, %v135_v59  ;;  %v940_v3 = vpack.c.bf16 %v136_v2, %v134_v1  ;;  %v90_v4 = vld [vmem:[#allocation3] sm:$0xff]  ;;  %v91_v5 = vld [vmem:[#allocation3 + $0x8] sm:$0xff]  ;;  %v92_v6 = vld [vmem:[#allocation3 + $0x10] sm:$0xff]  ;;  %v141_v50 = vshrl.u32 %v140_v49, 7 }
  0x47   :  { %925 = vmatpush1.bf16.msra.mxu0 %v924_v26  ;;  %v93_v7 = vld [vmem:[#allocation3 + $0x18] sm:$0xff]  ;;  %v94_v8 = vld [vmem:[#allocation3 + $0x20] sm:$0xff]  ;;  %v95_v9 = vld [vmem:[#allocation3 + $0x28] sm:$0xff] }
  0x48   :  { %927 = vmatprep.subr.bf16.mxu0 %v926_v27  ;;  %949 = vmatpush3.bf16.msra.mxu1 %v948_v53  ;;  %v96_v10 = vld [vmem:[#allocation3 + $0x30] sm:$0xff]  ;;  %v97_v11 = vld [vmem:[#allocation3 + $0x38] sm:$0xff]  ;;  %v98_v12 = vld [vmem:[#allocation3 + $0x40] sm:$0xff]  ;;  %v146_v53 = vsub.s32 1, %v141_v50 }
  0x49   :  { %951 = vmatprep.subr.bf16.mxu1 %v950_v56  ;;  %v99_v13 = vld [vmem:[#allocation3 + $0x48] sm:$0xff]  ;;  %v100_v14 = vld [vmem:[#allocation3 + $0x50] sm:$0xff]  ;;  %v101_v15 = vld [vmem:[#allocation3 + $0x58] sm:$0xff] }
  0x4a   :  { %v102_v16 = vld [vmem:[#allocation3 + $0x60] sm:$0xff]  ;;  %v103_v17 = vld [vmem:[#allocation3 + $0x68] sm:$0xff]  ;;  %v104_v18 = vld [vmem:[#allocation3 + $0x70] sm:$0xff] }
  0x4b   :  { %929 = vmatpush1.bf16.msra.mxu0 %v928_v34  ;;  %v105_v19 = vld [vmem:[#allocation3 + $0x78] sm:$0xff]  ;;  %v509_v20 = vld [vmem:[#allocation8 + $0xb0] sm:$0xff]  ;;  %v511_v26 = vld [vmem:[#allocation8 + $0xc0] sm:$0xff] }
  0x4c   :  { %931 = vmatprep.subr.bf16.mxu0 %v930_v40  ;;  %953 = vmatpush3.bf16.msra.mxu1 %v952_v62  ;;  %v510_v21 = vld [vmem:[#allocation8 + $0xb8] sm:$0xff]  ;;  %v493_v23 = vld [vmem:[#allocation8 + $0x30] sm:$0xff]  ;;  %v512_v27 = vld [vmem:[#allocation8 + $0xc8] sm:$0xff] }
  0x4d   :  { %v954_v22 = vpack.c.bf16 %v510_v21, %v509_v20  ;;  %v494_v24 = vld [vmem:[#allocation8 + $0x38] sm:$0xff]  ;;  %v958_v28 = vpack.c.bf16 %v512_v27, %v511_v26  ;;  %v495_v29 = vld [vmem:[#allocation8 + $0x40] sm:$0xff]  ;;  %v496_v30 = vld [vmem:[#allocation8 + $0x48] sm:$0xff] }
  0x4e   :  { %v956_v25 = vpack.c.bf16 %v494_v24, %v493_v23  ;;  %v960_v31 = vpack.c.bf16 %v496_v30, %v495_v29  ;;  %v513_v32 = vld [vmem:[#allocation8 + $0xd0] sm:$0xff]  ;;  %v498_v35 = vld [vmem:[#allocation8 + $0x58] sm:$0xff]  ;;  %v515_v37 = vld [vmem:[#allocation8 + $0xe0] sm:$0xff] }
  0x4f   :  { %933 = vmatpush1.bf16.msra.mxu0 %v932_v51  ;;  %955 = vmatprep.subr.bf16.mxu1 %v954_v22  ;;  %v497_v34 = vld [vmem:[#allocation8 + $0x50] sm:$0xff]  ;;  %v516_v38 = vld [vmem:[#allocation8 + $0xe8] sm:$0xff]  ;;  %v499_v40 = vld [vmem:[#allocation8 + $0x60] sm:$0xff]  ;;  %v142_v51 = vsub.s32 0, %v141_v50 }
  0x50   :  { %935 = vmatprep.subr.bf16.mxu0 %v934_v54  ;;  %957 = vmatpush3.bf16.msra.mxu1 %v956_v25  ;;  %v964_v36 = vpack.c.bf16 %v498_v35, %v497_v34  ;;  %v966_v39 = vpack.c.bf16 %v516_v38, %v515_v37  ;;  %v500_v41 = vld [vmem:[#allocation8 + $0x68] sm:$0xff]  ;;  %v517_v43 = vld [vmem:[#allocation8 + $0xf0] sm:$0xff]  ;;  %v518_v44 = vld [vmem:[#allocation8 + $0xf8] sm:$0xff] }
  0x51   :  { %959 = vmatprep.subr.bf16.mxu1 %v958_v28  ;;  %v968_v42 = vpack.c.bf16 %v500_v41, %v499_v40  ;;  %v970_v45 = vpack.c.bf16 %v518_v44, %v517_v43  ;;  %v501_v46 = vld [vmem:[#allocation8 + $0x70] sm:$0xff]  ;;  %v502_v47 = vld [vmem:[#allocation8 + $0x78] sm:$0xff]  ;;  %v138_v52 = vld [vmem:[%s1427_s2] sm:$0x3] }
  0x52   :  { %v972_v48 = vpack.c.bf16 %v502_v47, %v501_v46  ;;  %v1273_v54 = vrot.slane %v138_v52, %v142_v51  ;;  %v1275_v55 = vrot.slane %v138_v52, %v146_v53 }
  0x53   :  { %937 = vmatpush1.bf16.msra.mxu0 %v936_v61 }
  0x54   :  { %939 = vmatprep.subr.bf16.mxu0 %v938_v63  ;;  %961 = vmatpush3.bf16.msra.mxu1 %v960_v31 }
  0x57   :  { %941 = vmatpush1.bf16.msra.mxu0 %v940_v3 }
  0x5a   :  { %215 = vmatmul.mubr.f32.vlgmr.msra.gmra.mrb[0].mxu0 %v90_v4 }
  0x5b   :  { %220 = vmatprep.mubr.f32.mxu0 %v1180_v0 }
  0x5e   :  { %221 = vmatmul.mubr.f32.gmra.mrb[2].mxu0 %v91_v5 }
  0x5f   :  { %226 = vmatprep.mubr.f32.mxu0 %v1180_v0 }
  0x62   :  { %227 = vmatmul.mubr.f32.gmra.mrb[4].mxu0 %v92_v6 }
  0x63   :  { %232 = vmatprep.mubr.f32.mxu0 %v1180_v0 }
  0x66   :  { %233 = vmatmul.mubr.f32.gmra.mrb[6].mxu0 %v93_v7 }
  0x67   :  { %238 = vmatprep.mubr.f32.mxu0 %v1180_v0 }
  0x6a   :  { %239 = vmatmul.mubr.f32.gmra.mrb[8].mxu0 %v94_v8 }
  0x6b   :  { %244 = vmatprep.mubr.f32.mxu0 %v1180_v0 }
  0x6e   :  { %245 = vmatmul.mubr.f32.gmra.mrb[10].mxu0 %v95_v9 }
  0x6f   :  { %250 = vmatprep.mubr.f32.mxu0 %v1180_v0 }
  0x72   :  { %251 = vmatmul.mubr.f32.gmra.mrb[12].mxu0 %v96_v10 }
  0x73   :  { %256 = vmatprep.mubr.f32.mxu0 %v1180_v0 }
  0x76   :  { %257 = vmatmul.mubr.f32.gmra.mrb[14].mxu0 %v97_v11 }
  0x77   :  { %262 = vmatprep.mubr.f32.mxu0 %v1180_v0 }
  0x7a   :  { %263 = vmatmul.mubr.f32.gmra.mrb[16].mxu0 %v98_v12 }
  0x7b   :  { %268 = vmatprep.mubr.f32.mxu0 %v1180_v0 }
  0x7e   :  { %269 = vmatmul.mubr.f32.gmra.mrb[18].mxu0 %v99_v13 }
  0x7f   :  { %274 = vmatprep.mubr.f32.mxu0 %v1180_v0 }
  0x82   :  { %275 = vmatmul.mubr.f32.gmra.mrb[20].mxu0 %v100_v14 }
  0x83   :  { %280 = vmatprep.mubr.f32.mxu0 %v1180_v0 }
  0x86   :  { %281 = vmatmul.mubr.f32.gmra.mrb[22].mxu0 %v101_v15 }
  0x87   :  { %286 = vmatprep.mubr.f32.mxu0 %v1180_v0 }
  0x8a   :  { %287 = vmatmul.mubr.f32.gmra.mrb[24].mxu0 %v102_v16 }
  0x8b   :  { %292 = vmatprep.mubr.f32.mxu0 %v1180_v0 }
  0x8e   :  { %293 = vmatmul.mubr.f32.gmra.mrb[26].mxu0 %v103_v17 }
  0x8f   :  { %298 = vmatprep.mubr.f32.mxu0 %v1180_v0 }
  0x92   :  { %299 = vmatmul.mubr.f32.gmra.mrb[28].mxu0 %v104_v18 }
  0x93   :  { %304 = vmatprep.mubr.f32.mxu0 %v1180_v0  ;;  %v514_v0 = vld [vmem:[#allocation8 + $0xd8] sm:$0xff] }
  0x94   :  { %v962_v33 = vpack.c.bf16 %v514_v0, %v513_v32 }
  0x96   :  { %305 = vmatmul.mubr.f32.gmra.mrb[30].mxu0 %v105_v19  ;;  %963 = vmatprep.subr.bf16.mxu1 %v962_v33 }
  0x97   :  { %965 = vmatpush3.bf16.msra.mxu1 %v964_v36 }
  0x98   :  { %967 = vmatprep.subr.bf16.mxu1 %v966_v39 }
  0x9b   :  { %969 = vmatpush3.bf16.msra.mxu1 %v968_v42 }
  0x9c   :  { %971 = vmatprep.subr.bf16.mxu1 %v970_v45 }
  0x9f   :  { %973 = vmatpush3.bf16.msra.mxu1 %v972_v48 }
 0x12d   :  { %v216_v56 = vpop.f32.mrb[0].mxu0 }
 0x12e   :  { %v217_v57 = vadd.f32 %v216_v56, %v1273_v54  ;;  %v218_v58 = vpop.f32.mrb[1].mxu0 }
 0x12f   :  { %v219_v59 = vadd.f32 %v218_v58, %v1275_v55 }
 0x130   :  { %v343_v60 = vmul.f32 0.70710677, %v217_v57  ;;  %v311_v25 = vmul.f32 0.5, %v217_v57 }
 0x131   :  { %v344_v61 = vmul.f32 0.70710677, %v219_v59  ;;  %v222_v62 = vpop.f32.mrb[2].mxu0  ;;  %v312_v23 = vmul.f32 0.5, %v219_v59 }
 0x132   :  { %983 = verf.f32 %v343_v60  ;;  %v223_v63 = vadd.f32 %v222_v62, %v1273_v54  ;;  %v224_v1 = vpop.f32.mrb[3].mxu0 }
 0x133   :  { %985 = verf.f32 %v344_v61  ;;  %v225_v2 = vadd.f32 %v224_v1, %v1275_v55 }
 0x134   :  { %v345_v3 = vmul.f32 0.70710677, %v223_v63  ;;  %v313_v38 = vmul.f32 0.5, %v223_v63 }
 0x135   :  { %v346_v4 = vmul.f32 0.70710677, %v225_v2  ;;  %v228_v5 = vpop.f32.mrb[4].mxu0  ;;  %v314_v34 = vmul.f32 0.5, %v225_v2 }
 0x136   :  { %987 = verf.f32 %v345_v3  ;;  %v229_v6 = vadd.f32 %v228_v5, %v1273_v54  ;;  %v230_v7 = vpop.f32.mrb[5].mxu0 }
 0x137   :  { %989 = verf.f32 %v346_v4  ;;  %v231_v8 = vadd.f32 %v230_v7, %v1275_v55 }
 0x138   :  { %v347_v9 = vmul.f32 0.70710677, %v229_v6  ;;  %v315_v52 = vmul.f32 0.5, %v229_v6 }
 0x139   :  { %v348_v10 = vmul.f32 0.70710677, %v231_v8  ;;  %v234_v11 = vpop.f32.mrb[6].mxu0  ;;  %v316_v48 = vmul.f32 0.5, %v231_v8 }
 0x13a   :  { %991 = verf.f32 %v347_v9  ;;  %v1284_v12 = vadd.f32 %v234_v11, %v1273_v54  ;;  %v236_v13 = vpop.f32.mrb[7].mxu0 }
 0x13b   :  { %993 = verf.f32 %v348_v10  ;;  %v237_v14 = vadd.f32 %v236_v13, %v1275_v55 }
 0x13c   :  { %v984_v15 = vpop.eup %983  ;;  %v349_v16 = vmul.f32 0.70710677, %v1284_v12  ;;  %v317_v5 = vmul.f32 0.5, %v1284_v12 }
 0x13d   :  { %v986_v17 = vpop.eup %985  ;;  %v407_v18 = vadd.f32 1.0, %v984_v15  ;;  %v350_v19 = vmul.f32 0.70710677, %v237_v14  ;;  %v240_v20 = vpop.f32.mrb[8].mxu0  ;;  %v318_v1 = vmul.f32 0.5, %v237_v14 }
 0x13e   :  { %995 = verf.f32 %v349_v16  ;;  %v1289_v21 = vadd.f32 %v240_v20, %v1273_v54  ;;  %v242_v22 = vpop.f32.mrb[9].mxu0  ;;  %v408_v24 = vadd.f32 1.0, %v986_v17 }
 0x13f   :  { %997 = verf.f32 %v350_v19  ;;  %v1292_v26 = vadd.f32 %v242_v22, %v1275_v55  ;;  %v439_v33 = vmul.f32 %v407_v18, %v311_v25 }
 0x140   :  { %v988_v27 = vpop.eup %987  ;;  %v351_v28 = vmul.f32 0.70710677, %v1289_v21  ;;  %v440_v29 = vmul.f32 %v408_v24, %v312_v23  ;;  %v319_v19 = vmul.f32 0.5, %v1289_v21 }
 0x141   :  { %v990_v30 = vpop.eup %989  ;;  %v409_v31 = vadd.f32 1.0, %v988_v27  ;;  %v352_v32 = vmul.f32 0.70710677, %v1292_v26  ;;  %v246_v0 = vpop.f32.mrb[10].mxu0  ;;  %v320_v16 = vmul.f32 0.5, %v1292_v26 }
 0x142   :  { %v410_v35 = vadd.f32 1.0, %v990_v30  ;;  %999 = verf.f32 %v351_v28  ;;  %v1297_v36 = vadd.f32 %v246_v0, %v1273_v54  ;;  %v248_v37 = vpop.f32.mrb[11].mxu0  ;;  %583 = vmatprep.mubr.f32.mxu1 %v440_v29 }
 0x143   :  { %1001 = verf.f32 %v352_v32  ;;  %v1300_v39 = vadd.f32 %v248_v37, %v1275_v55  ;;  %584 = vmatmul.mubr.f32.vlgmr.msra.gmra.mrb[0].mxu1 %v439_v33  ;;  %v441_v47 = vmul.f32 %v409_v31, %v313_v38 }
 0x144   :  { %v992_v40 = vpop.eup %991  ;;  %v353_v41 = vmul.f32 0.70710677, %v1297_v36  ;;  %v442_v42 = vmul.f32 %v410_v35, %v314_v34  ;;  %v321_v0 = vmul.f32 0.5, %v1297_v36 }
 0x145   :  { %v994_v43 = vpop.eup %993  ;;  %v411_v44 = vadd.f32 1.0, %v992_v40  ;;  %v354_v45 = vmul.f32 0.70710677, %v1300_v39  ;;  %v252_v46 = vpop.f32.mrb[12].mxu0  ;;  %v322_v30 = vmul.f32 0.5, %v1300_v39 }
 0x146   :  { %v412_v49 = vadd.f32 1.0, %v994_v43  ;;  %1003 = verf.f32 %v353_v41  ;;  %v1305_v50 = vadd.f32 %v252_v46, %v1273_v54  ;;  %v254_v51 = vpop.f32.mrb[13].mxu0  ;;  %588 = vmatprep.mubr.f32.mxu1 %v442_v42 }
 0x147   :  { %1005 = verf.f32 %v354_v45  ;;  %v1308_v53 = vadd.f32 %v254_v51, %v1275_v55  ;;  %589 = vmatmul.mubr.f32.gmra.mrb[2].mxu1 %v441_v47  ;;  %v443_v63 = vmul.f32 %v411_v44, %v315_v52 }
 0x148   :  { %v996_v56 = vpop.eup %995  ;;  %v355_v57 = vmul.f32 0.70710677, %v1305_v50  ;;  %v444_v58 = vmul.f32 %v412_v49, %v316_v48  ;;  %v323_v46 = vmul.f32 0.5, %v1305_v50 }
 0x149   :  { %v998_v59 = vpop.eup %997  ;;  %v413_v60 = vadd.f32 1.0, %v996_v56  ;;  %v356_v61 = vmul.f32 0.70710677, %v1308_v53  ;;  %v258_v62 = vpop.f32.mrb[14].mxu0  ;;  %v324_v43 = vmul.f32 0.5, %v1308_v53 }
 0x14a   :  { %v414_v2 = vadd.f32 1.0, %v998_v59  ;;  %1007 = verf.f32 %v355_v57  ;;  %v1313_v3 = vadd.f32 %v258_v62, %v1273_v54  ;;  %v260_v4 = vpop.f32.mrb[15].mxu0  ;;  %593 = vmatprep.mubr.f32.mxu1 %v444_v58 }
 0x14b   :  { %1009 = verf.f32 %v356_v61  ;;  %v1317_v6 = vadd.f32 %v260_v4, %v1275_v55  ;;  %594 = vmatmul.mubr.f32.gmra.mrb[4].mxu1 %v443_v63  ;;  %v445_v15 = vmul.f32 %v413_v60, %v317_v5 }
 0x14c   :  { %v1000_v7 = vpop.eup %999  ;;  %v357_v8 = vmul.f32 0.70710677, %v1313_v3  ;;  %v446_v9 = vmul.f32 %v414_v2, %v318_v1  ;;  %v325_v62 = vmul.f32 0.5, %v1313_v3 }
 0x14d   :  { %v1002_v10 = vpop.eup %1001  ;;  %v415_v11 = vadd.f32 1.0, %v1000_v7  ;;  %v358_v13 = vmul.f32 0.70710677, %v1317_v6  ;;  %v264_v14 = vpop.f32.mrb[16].mxu0  ;;  %v326_v59 = vmul.f32 0.5, %v1317_v6 }
 0x14e   :  { %v416_v17 = vadd.f32 1.0, %v1002_v10  ;;  %1011 = verf.f32 %v357_v8  ;;  %v1323_v12 = vadd.f32 %v264_v14, %v1273_v54  ;;  %v266_v18 = vpop.f32.mrb[17].mxu0  ;;  %598 = vmatprep.mubr.f32.mxu1 %v446_v9 }
 0x14f   :  { %1013 = verf.f32 %v358_v13  ;;  %v1327_v20 = vadd.f32 %v266_v18, %v1275_v55  ;;  %599 = vmatmul.mubr.f32.gmra.mrb[6].mxu1 %v445_v15  ;;  %v447_v29 = vmul.f32 %v415_v11, %v319_v19 }
 0x150   :  { %v1004_v22 = vpop.eup %1003  ;;  %v359_v23 = vmul.f32 0.70710677, %v1323_v12  ;;  %v448_v24 = vmul.f32 %v416_v17, %v320_v16  ;;  %v327_v14 = vmul.f32 0.5, %v1323_v12 }
 0x151   :  { %v1006_v25 = vpop.eup %1005  ;;  %v417_v26 = vadd.f32 1.0, %v1004_v22  ;;  %v360_v27 = vmul.f32 0.70710677, %v1327_v20  ;;  %v270_v28 = vpop.f32.mrb[18].mxu0  ;;  %v328_v10 = vmul.f32 0.5, %v1327_v20 }
 0x152   :  { %v418_v31 = vadd.f32 1.0, %v1006_v25  ;;  %1015 = verf.f32 %v359_v23  ;;  %v1333_v21 = vadd.f32 %v270_v28, %v1273_v54  ;;  %v272_v32 = vpop.f32.mrb[19].mxu0  ;;  %603 = vmatprep.mubr.f32.mxu1 %v448_v24 }
 0x153   :  { %1017 = verf.f32 %v360_v27  ;;  %v1337_v33 = vadd.f32 %v272_v32, %v1275_v55  ;;  %604 = vmatmul.mubr.f32.gmra.mrb[8].mxu1 %v447_v29  ;;  %v449_v42 = vmul.f32 %v417_v26, %v321_v0 }
 0x154   :  { %v1008_v34 = vpop.eup %1007  ;;  %v361_v35 = vmul.f32 0.70710677, %v1333_v21  ;;  %v450_v37 = vmul.f32 %v418_v31, %v322_v30  ;;  %v329_v28 = vmul.f32 0.5, %v1333_v21 }
 0x155   :  { %v1010_v38 = vpop.eup %1009  ;;  %v419_v39 = vadd.f32 1.0, %v1008_v34  ;;  %v362_v40 = vmul.f32 0.70710677, %v1337_v33  ;;  %v276_v41 = vpop.f32.mrb[20].mxu0  ;;  %v330_v25 = vmul.f32 0.5, %v1337_v33 }
 0x156   :  { %v420_v44 = vadd.f32 1.0, %v1010_v38  ;;  %1019 = verf.f32 %v361_v35  ;;  %v1343_v36 = vadd.f32 %v276_v41, %v1273_v54  ;;  %v278_v45 = vpop.f32.mrb[21].mxu0  ;;  %608 = vmatprep.mubr.f32.mxu1 %v450_v37 }
 0x157   :  { %1021 = verf.f32 %v362_v40  ;;  %v1347_v47 = vadd.f32 %v278_v45, %v1275_v55  ;;  %609 = vmatmul.mubr.f32.gmra.mrb[10].mxu1 %v449_v42  ;;  %v451_v58 = vmul.f32 %v419_v39, %v323_v46 }
 0x158   :  { %v1012_v48 = vpop.eup %1011  ;;  %v363_v49 = vmul.f32 0.70710677, %v1343_v36  ;;  %v452_v51 = vmul.f32 %v420_v44, %v324_v43  ;;  %v331_v41 = vmul.f32 0.5, %v1343_v36 }
 0x159   :  { %v1014_v52 = vpop.eup %1013  ;;  %v421_v53 = vadd.f32 1.0, %v1012_v48  ;;  %v364_v56 = vmul.f32 0.70710677, %v1347_v47  ;;  %v282_v57 = vpop.f32.mrb[22].mxu0  ;;  %v332_v38 = vmul.f32 0.5, %v1347_v47 }
 0x15a   :  { %v422_v60 = vadd.f32 1.0, %v1014_v52  ;;  %1023 = verf.f32 %v363_v49  ;;  %v1353_v50 = vadd.f32 %v282_v57, %v1273_v54  ;;  %v284_v61 = vpop.f32.mrb[23].mxu0  ;;  %613 = vmatprep.mubr.f32.mxu1 %v452_v51 }
 0x15b   :  { %1025 = verf.f32 %v364_v56  ;;  %v1357_v63 = vadd.f32 %v284_v61, %v1275_v55  ;;  %614 = vmatmul.mubr.f32.gmra.mrb[12].mxu1 %v451_v58  ;;  %v453_v9 = vmul.f32 %v421_v53, %v325_v62 }
 0x15c   :  { %v1016_v1 = vpop.eup %1015  ;;  %v365_v2 = vmul.f32 0.70710677, %v1353_v50  ;;  %v454_v4 = vmul.f32 %v422_v60, %v326_v59  ;;  %v333_v36 = vmul.f32 0.5, %v1353_v50 }
 0x15d   :  { %v1018_v5 = vpop.eup %1017  ;;  %v423_v6 = vadd.f32 1.0, %v1016_v1  ;;  %v366_v7 = vmul.f32 0.70710677, %v1357_v63  ;;  %v288_v8 = vpop.f32.mrb[24].mxu0  ;;  %v334_v52 = vmul.f32 0.5, %v1357_v63 }
 0x15e   :  { %v424_v11 = vadd.f32 1.0, %v1018_v5  ;;  %1027 = verf.f32 %v365_v2  ;;  %v1363_v3 = vadd.f32 %v288_v8, %v1273_v54  ;;  %v290_v13 = vpop.f32.mrb[25].mxu0  ;;  %618 = vmatprep.mubr.f32.mxu1 %v454_v4 }
 0x15f   :  { %1029 = verf.f32 %v366_v7  ;;  %v1367_v15 = vadd.f32 %v290_v13, %v1275_v55  ;;  %619 = vmatmul.mubr.f32.gmra.mrb[14].mxu1 %v453_v9  ;;  %v455_v24 = vmul.f32 %v423_v6, %v327_v14 }
 0x160   :  { %v1020_v16 = vpop.eup %1019  ;;  %v367_v17 = vmul.f32 0.70710677, %v1363_v3  ;;  %v456_v18 = vmul.f32 %v424_v11, %v328_v10 }
 0x161   :  { %v1022_v19 = vpop.eup %1021  ;;  %v425_v20 = vadd.f32 1.0, %v1020_v16  ;;  %v368_v22 = vmul.f32 0.70710677, %v1367_v15  ;;  %v294_v23 = vpop.f32.mrb[26].mxu0  ;;  %v336_v63 = vmul.f32 0.5, %v1367_v15 }
 0x162   :  { %v426_v26 = vadd.f32 1.0, %v1022_v19  ;;  %1031 = verf.f32 %v367_v17  ;;  %v1373_v12 = vadd.f32 %v294_v23, %v1273_v54  ;;  %v296_v27 = vpop.f32.mrb[27].mxu0  ;;  %623 = vmatprep.mubr.f32.mxu1 %v456_v18 }
 0x163   :  { %1033 = verf.f32 %v368_v22  ;;  %v297_v29 = vadd.f32 %v296_v27, %v1275_v55  ;;  %624 = vmatmul.mubr.f32.gmra.mrb[16].mxu1 %v455_v24  ;;  %v457_v37 = vmul.f32 %v425_v20, %v329_v28 }
 0x164   :  { %v1024_v30 = vpop.eup %1023  ;;  %v369_v31 = vmul.f32 0.70710677, %v1373_v12  ;;  %v458_v32 = vmul.f32 %v426_v26, %v330_v25  ;;  %v337_v11 = vmul.f32 0.5, %v1373_v12 }
 0x165   :  { %v1026_v0 = vpop.eup %1025  ;;  %v427_v34 = vadd.f32 1.0, %v1024_v30  ;;  %v370_v33 = vmul.f32 0.70710677, %v297_v29  ;;  %v300_v35 = vpop.f32.mrb[28].mxu0  ;;  %v338_v9 = vmul.f32 0.5, %v297_v29 }
 0x166   :  { %v428_v39 = vadd.f32 1.0, %v1026_v0  ;;  %1035 = verf.f32 %v369_v31  ;;  %v301_v40 = vadd.f32 %v300_v35, %v1273_v54  ;;  %v302_v21 = vpop.f32.mrb[29].mxu0  ;;  %628 = vmatprep.mubr.f32.mxu1 %v458_v32  ;;  %v1392_v31 = vld [vmem:[%s1429_s4] ss:$0 sm:$0xff]  ;;  %s1181_s4 = smov [#allocation9]  }
 0x167   :  { %1037 = verf.f32 %v370_v33  ;;  %v303_v42 = vadd.f32 %v302_v21, %v1275_v55  ;;  %629 = vmatmul.mubr.f32.gmra.mrb[18].mxu1 %v457_v37  ;;  %v459_v47 = vmul.f32 %v427_v34, %v331_v41  ;;  %s816_s8 = sshll.u32 %s1181_s4, 4  ;;  %s817_s8 = int_to_ptr.vmem [resolvable:$true] %s816_s8 }
 0x168   :  { %v1028_v43 = vpop.eup %1027  ;;  %v371_v44 = vmul.f32 0.70710677, %v301_v40  ;;  %v460_v45 = vmul.f32 %v428_v39, %v332_v38  ;;  %v339_v19 = vmul.f32 0.5, %v301_v40  ;;  %s1145_s9 = scalar_lea.vmem %s817_s8, 2048  ;;  %p1150_p11 = scmp.lt.s32.totalorder %s817_s8, %s817_s8 }
 0x169   :  { %v1030_v46 = vpop.eup %1029  ;;  %v429_v48 = vadd.f32 1.0, %v1028_v43  ;;  %v372_v49 = vmul.f32 0.70710677, %v303_v42  ;;  %v306_v51 = vpop.f32.mrb[30].mxu0  ;;  %v340_v18 = vmul.f32 0.5, %v303_v42  ;;  %p1146_p10 = scmp.ne.s32.totalorder %s817_s8, %s1145_s9  ;;  %p1151_p12 = scmp.lt.s32.totalorder %s1145_s9, %s1145_s9 }
 0x16a   :  { %v430_v53 = vadd.f32 1.0, %v1030_v46  ;;  %1039 = verf.f32 %v371_v44  ;;  %v307_v56 = vadd.f32 %v306_v51, %v1273_v54  ;;  %v308_v57 = vpop.f32.mrb[31].mxu0  ;;  %633 = vmatprep.mubr.f32.mxu1 %v460_v45  ;;  %v335_v54 = vmul.f32 0.5, %v1363_v3 }
 0x16b   :  { %1041 = verf.f32 %v372_v49  ;;  %v309_v58 = vadd.f32 %v308_v57, %v1275_v55  ;;  %634 = vmatmul.mubr.f32.gmra.mrb[20].mxu1 %v459_v47  ;;  %v461_v4 = vmul.f32 %v429_v48, %v333_v36  ;;  %p1152_p13 = por %p1151_p12, %p1150_p11 }
 0x16c   :  { %v1032_v59 = vpop.eup %1031  ;;  %v373_v60 = vmul.f32 0.70710677, %v307_v56  ;;  %v462_v61 = vmul.f32 %v430_v53, %v334_v52  ;;  %v341_v12 = vmul.f32 0.5, %v307_v56 }
 0x16d   :  { %v1034_v62 = vpop.eup %1033  ;;  %v431_v1 = vadd.f32 1.0, %v1032_v59  ;;  %v374_v2 = vmul.f32 0.70710677, %v309_v58  ;;  %v342_v26 = vmul.f32 0.5, %v309_v58  ;;  %p1153_p0 = pnand %p1152_p13, %p1146_p10 }
 0x16e   :  { %v432_v5 = vadd.f32 1.0, %v1034_v62  ;;  %1043 = verf.f32 %v373_v60  ;;  %638 = vmatprep.mubr.f32.mxu1 %v462_v61 }
 0x16f   :  { %1045 = verf.f32 %v374_v2  ;;  %639 = vmatmul.mubr.f32.gmra.mrb[22].mxu1 %v461_v4  ;;  %v463_v8 = vmul.f32 %v431_v1, %v335_v54 }
 0x170   :  { %v1036_v50 = vpop.eup %1035  ;;  %v464_v6 = vmul.f32 %v432_v5, %v336_v63 }
 0x171   :  { %v1038_v55 = vpop.eup %1037  ;;  %v433_v7 = vadd.f32 1.0, %v1036_v50 }
 0x172   :  { %v434_v10 = vadd.f32 1.0, %v1038_v55  ;;  %643 = vmatprep.mubr.f32.mxu1 %v464_v6 }
 0x173   :  { %644 = vmatmul.mubr.f32.gmra.mrb[24].mxu1 %v463_v8  ;;  %v465_v17 = vmul.f32 %v433_v7, %v337_v11 }
 0x174   :  { %v1040_v13 = vpop.eup %1039  ;;  %v466_v14 = vmul.f32 %v434_v10, %v338_v9 }
 0x175   :  { %v1042_v15 = vpop.eup %1041  ;;  %v435_v16 = vadd.f32 1.0, %v1040_v13 }
 0x176   :  { %v436_v3 = vadd.f32 1.0, %v1042_v15  ;;  %648 = vmatprep.mubr.f32.mxu1 %v466_v14 }
 0x177   :  { %649 = vmatmul.mubr.f32.gmra.mrb[26].mxu1 %v465_v17  ;;  %v467_v25 = vmul.f32 %v435_v16, %v339_v19 }
 0x178   :  { %v1044_v20 = vpop.eup %1043  ;;  %v468_v22 = vmul.f32 %v436_v3, %v340_v18 }
 0x179   :  { %v1046_v23 = vpop.eup %1045  ;;  %v437_v24 = vadd.f32 1.0, %v1044_v20 }
 0x17a   :  { %v438_v27 = vadd.f32 1.0, %v1046_v23  ;;  %653 = vmatprep.mubr.f32.mxu1 %v468_v22 }
 0x17b   :  { %654 = vmatmul.mubr.f32.gmra.mrb[28].mxu1 %v467_v25  ;;  %v469_v29 = vmul.f32 %v437_v24, %v341_v12 }
 0x17c   :  { %v470_v28 = vmul.f32 %v438_v27, %v342_v26 }
 0x17e   :  { %658 = vmatprep.mubr.f32.mxu1 %v470_v28 }
 0x17f   :  { %659 = vmatmul.mubr.f32.gmra.mrb[30].mxu1 %v469_v29 }
 0x216   :  { %v862_v30 = vpop.f32.mrb[0].mxu1 }
 0x217   :  { %v863_v32 = vpop.f32.mrb[1].mxu1 }
 0x218   :  { %v864_v0 = vadd.f32 %v863_v32, %v862_v30 }
 0x21a   :  { %v664_v34 = vadd.f32 %v864_v0, %v1392_v31  ;;  %v865_v33 = vpop.f32.mrb[2].mxu1 }
 0x21b   :  { %v866_v35 = vpop.f32.mrb[3].mxu1 }
 0x21c   :  { %v731_v37 = vmul.f32 0.70710677, %v664_v34  ;;  %v867_v38 = vadd.f32 %v866_v35, %v865_v33  ;;  %v715_v57 = vmul.f32 0.5, %v664_v34 }
 0x21e   :  { %1047 = verf.f32 %v731_v37  ;;  %v665_v39 = vadd.f32 %v867_v38, %v1392_v31  ;;  %v868_v40 = vpop.f32.mrb[4].mxu1 }
 0x21f   :  { %v869_v21 = vpop.f32.mrb[5].mxu1 }
 0x220   :  { %v732_v41 = vmul.f32 0.70710677, %v665_v39  ;;  %v870_v42 = vadd.f32 %v869_v21, %v868_v40  ;;  %v716_v4 = vmul.f32 0.5, %v665_v39 }
 0x222   :  { %1049 = verf.f32 %v732_v41  ;;  %v666_v43 = vadd.f32 %v870_v42, %v1392_v31  ;;  %v871_v44 = vpop.f32.mrb[6].mxu1 }
 0x223   :  { %v872_v45 = vpop.f32.mrb[7].mxu1 }
 0x224   :  { %v733_v46 = vmul.f32 0.70710677, %v666_v43  ;;  %v873_v48 = vadd.f32 %v872_v45, %v871_v44  ;;  %v717_v9 = vmul.f32 0.5, %v666_v43 }
 0x226   :  { %1051 = verf.f32 %v733_v46  ;;  %v667_v49 = vadd.f32 %v873_v48, %v1392_v31  ;;  %v874_v51 = vpop.f32.mrb[8].mxu1 }
 0x227   :  { %v875_v47 = vpop.f32.mrb[9].mxu1 }
 0x228   :  { %v1048_v52 = vpop.eup %1047  ;;  %v734_v53 = vmul.f32 0.70710677, %v667_v49  ;;  %v876_v56 = vadd.f32 %v875_v47, %v874_v51  ;;  %v718_v3 = vmul.f32 0.5, %v667_v49 }
 0x229   :  { %v763_v36 = vadd.f32 1.0, %v1048_v52 }
 0x22a   :  { %1053 = verf.f32 %v734_v53  ;;  %v668_v58 = vadd.f32 %v876_v56, %v1392_v31  ;;  %v877_v59 = vpop.f32.mrb[10].mxu1 }
 0x22b   :  { %v779_v60 = vmul.f32 %v763_v36, %v715_v57  ;;  %v878_v61 = vpop.f32.mrb[11].mxu1 }
 0x22c   :  { %v1050_v62 = vpop.eup %1049  ;;  %v735_v1 = vmul.f32 0.70710677, %v668_v58  ;;  %v879_v2 = vadd.f32 %v878_v61, %v877_v59  ;;  %v719_v12 = vmul.f32 0.5, %v668_v58 }
 0x22d   :  { %795 = vst [vmem:[#allocation9] sm:$0xff] %v779_v60  ;;  %v764_v63 = vadd.f32 1.0, %v1050_v62 }
 0x22e   :  { %1055 = verf.f32 %v735_v1  ;;  %v669_v5 = vadd.f32 %v879_v2, %v1392_v31  ;;  %v880_v54 = vpop.f32.mrb[12].mxu1 }
 0x22f   :  { %v780_v50 = vmul.f32 %v764_v63, %v716_v4  ;;  %v881_v6 = vpop.f32.mrb[13].mxu1 }
 0x230   :  { %v1052_v55 = vpop.eup %1051  ;;  %v736_v7 = vmul.f32 0.70710677, %v669_v5  ;;  %v882_v8 = vadd.f32 %v881_v6, %v880_v54  ;;  %v720_v37 = vmul.f32 0.5, %v669_v5 }
 0x231   :  { %796 = vst [vmem:[#allocation9 + $0x8] sm:$0xff] %v780_v50  ;;  %v765_v10 = vadd.f32 1.0, %v1052_v55 }
 0x232   :  { %1057 = verf.f32 %v736_v7  ;;  %v670_v11 = vadd.f32 %v882_v8, %v1392_v31  ;;  %v883_v13 = vpop.f32.mrb[14].mxu1 }
 0x233   :  { %v781_v14 = vmul.f32 %v765_v10, %v717_v9  ;;  %v884_v15 = vpop.f32.mrb[15].mxu1 }
 0x234   :  { %v1054_v16 = vpop.eup %1053  ;;  %v737_v17 = vmul.f32 0.70710677, %v670_v11  ;;  %v885_v18 = vadd.f32 %v884_v15, %v883_v13  ;;  %v721_v45 = vmul.f32 0.5, %v670_v11 }
 0x235   :  { %797 = vst [vmem:[#allocation9 + $0x10] sm:$0xff] %v781_v14  ;;  %v766_v19 = vadd.f32 1.0, %v1054_v16 }
 0x236   :  { %1059 = verf.f32 %v737_v17  ;;  %v671_v20 = vadd.f32 %v885_v18, %v1392_v31  ;;  %v886_v22 = vpop.f32.mrb[16].mxu1 }
 0x237   :  { %v782_v23 = vmul.f32 %v766_v19, %v718_v3  ;;  %v887_v24 = vpop.f32.mrb[17].mxu1 }
 0x238   :  { %v1056_v25 = vpop.eup %1055  ;;  %v738_v26 = vmul.f32 0.70710677, %v671_v20  ;;  %v888_v27 = vadd.f32 %v887_v24, %v886_v22  ;;  %v722_v57 = vmul.f32 0.5, %v671_v20 }
 0x239   :  { %798 = vst [vmem:[#allocation9 + $0x18] sm:$0xff] %v782_v23  ;;  %v767_v28 = vadd.f32 1.0, %v1056_v25 }
 0x23a   :  { %1061 = verf.f32 %v738_v26  ;;  %v672_v29 = vadd.f32 %v888_v27, %v1392_v31  ;;  %v889_v30 = vpop.f32.mrb[18].mxu1 }
 0x23b   :  { %v783_v32 = vmul.f32 %v767_v28, %v719_v12  ;;  %v890_v0 = vpop.f32.mrb[19].mxu1 }
 0x23c   :  { %v1058_v34 = vpop.eup %1057  ;;  %v739_v33 = vmul.f32 0.70710677, %v672_v29  ;;  %v891_v35 = vadd.f32 %v890_v0, %v889_v30  ;;  %v723_v4 = vmul.f32 0.5, %v672_v29 }
 0x23d   :  { %799 = vst [vmem:[#allocation9 + $0x20] sm:$0xff] %v783_v32  ;;  %v768_v38 = vadd.f32 1.0, %v1058_v34 }
 0x23e   :  { %1063 = verf.f32 %v739_v33  ;;  %v673_v39 = vadd.f32 %v891_v35, %v1392_v31  ;;  %v892_v40 = vpop.f32.mrb[20].mxu1 }
 0x23f   :  { %v784_v21 = vmul.f32 %v768_v38, %v720_v37  ;;  %v893_v41 = vpop.f32.mrb[21].mxu1 }
 0x240   :  { %v1060_v42 = vpop.eup %1059  ;;  %v740_v43 = vmul.f32 0.70710677, %v673_v39  ;;  %v894_v44 = vadd.f32 %v893_v41, %v892_v40  ;;  %v724_v9 = vmul.f32 0.5, %v673_v39 }
 0x241   :  { %800 = vst [vmem:[#allocation9 + $0x28] sm:$0xff] %v784_v21  ;;  %v769_v46 = vadd.f32 1.0, %v1060_v42 }
 0x242   :  { %1065 = verf.f32 %v740_v43  ;;  %v674_v48 = vadd.f32 %v894_v44, %v1392_v31  ;;  %v895_v49 = vpop.f32.mrb[22].mxu1 }
 0x243   :  { %v785_v51 = vmul.f32 %v769_v46, %v721_v45  ;;  %v896_v47 = vpop.f32.mrb[23].mxu1 }
 0x244   :  { %v1062_v52 = vpop.eup %1061  ;;  %v741_v53 = vmul.f32 0.70710677, %v674_v48  ;;  %v897_v56 = vadd.f32 %v896_v47, %v895_v49  ;;  %v725_v3 = vmul.f32 0.5, %v674_v48 }
 0x245   :  { %801 = vst [vmem:[#allocation9 + $0x30] sm:$0xff] %v785_v51  ;;  %v770_v36 = vadd.f32 1.0, %v1062_v52 }
 0x246   :  { %1067 = verf.f32 %v741_v53  ;;  %v675_v58 = vadd.f32 %v897_v56, %v1392_v31  ;;  %v898_v59 = vpop.f32.mrb[24].mxu1 }
 0x247   :  { %v786_v60 = vmul.f32 %v770_v36, %v722_v57  ;;  %v899_v61 = vpop.f32.mrb[25].mxu1 }
 0x248   :  { %v1064_v62 = vpop.eup %1063  ;;  %v742_v1 = vmul.f32 0.70710677, %v675_v58  ;;  %v900_v2 = vadd.f32 %v899_v61, %v898_v59  ;;  %v726_v12 = vmul.f32 0.5, %v675_v58 }
 0x249   :  { %802 = vst [vmem:[#allocation9 + $0x38] sm:$0xff] %v786_v60  ;;  %v771_v63 = vadd.f32 1.0, %v1064_v62 }
 0x24a   :  { %1069 = verf.f32 %v742_v1  ;;  %v676_v5 = vadd.f32 %v900_v2, %v1392_v31  ;;  %v901_v54 = vpop.f32.mrb[26].mxu1 }
 0x24b   :  { %v787_v50 = vmul.f32 %v771_v63, %v723_v4  ;;  %v902_v6 = vpop.f32.mrb[27].mxu1 }
 0x24c   :  { %v1066_v55 = vpop.eup %1065  ;;  %v743_v7 = vmul.f32 0.70710677, %v676_v5  ;;  %v903_v8 = vadd.f32 %v902_v6, %v901_v54  ;;  %v727_v34 = vmul.f32 0.5, %v676_v5 }
 0x24d   :  { %803 = vst [vmem:[#allocation9 + $0x40] sm:$0xff] %v787_v50  ;;  %v772_v10 = vadd.f32 1.0, %v1066_v55 }
 0x24e   :  { %1071 = verf.f32 %v743_v7  ;;  %v677_v11 = vadd.f32 %v903_v8, %v1392_v31  ;;  %v904_v13 = vpop.f32.mrb[28].mxu1 }
 0x24f   :  { %v788_v14 = vmul.f32 %v772_v10, %v724_v9  ;;  %v905_v15 = vpop.f32.mrb[29].mxu1 }
 0x250   :  { %v1068_v16 = vpop.eup %1067  ;;  %v744_v17 = vmul.f32 0.70710677, %v677_v11  ;;  %v906_v18 = vadd.f32 %v905_v15, %v904_v13  ;;  %v728_v38 = vmul.f32 0.5, %v677_v11 }
 0x251   :  { %804 = vst [vmem:[#allocation9 + $0x48] sm:$0xff] %v788_v14  ;;  %v773_v19 = vadd.f32 1.0, %v1068_v16 }
 0x252   :  { %1073 = verf.f32 %v744_v17  ;;  %v678_v20 = vadd.f32 %v906_v18, %v1392_v31  ;;  %v907_v22 = vpop.f32.mrb[30].mxu1 }
 0x253   :  { %v789_v23 = vmul.f32 %v773_v19, %v725_v3  ;;  %v908_v24 = vpop.f32.mrb[31].mxu1 }
 0x254   :  { %v1070_v25 = vpop.eup %1069  ;;  %v745_v26 = vmul.f32 0.70710677, %v678_v20  ;;  %v909_v27 = vadd.f32 %v908_v24, %v907_v22  ;;  %v729_v41 = vmul.f32 0.5, %v678_v20 }
 0x255   :  { %805 = vst [vmem:[#allocation9 + $0x50] sm:$0xff] %v789_v23  ;;  %v774_v28 = vadd.f32 1.0, %v1070_v25 }
 0x256   :  { %1075 = verf.f32 %v745_v26  ;;  %v679_v29 = vadd.f32 %v909_v27, %v1392_v31 }
 0x257   :  { %v790_v30 = vmul.f32 %v774_v28, %v726_v12 }
 0x258   :  { %v1072_v32 = vpop.eup %1071  ;;  %v746_v0 = vmul.f32 0.70710677, %v679_v29  ;;  %v730_v31 = vmul.f32 0.5, %v679_v29 }
 0x259   :  { %806 = vst [vmem:[#allocation9 + $0x58] sm:$0xff] %v790_v30  ;;  %v775_v33 = vadd.f32 1.0, %v1072_v32 }
 0x25a   :  { %1077 = verf.f32 %v746_v0 }
 0x25b   :  { %v791_v35 = vmul.f32 %v775_v33, %v727_v34 }
 0x25c   :  { %v1074_v37 = vpop.eup %1073 }
 0x25d   :  { %807 = vst [vmem:[#allocation9 + $0x60] sm:$0xff] %v791_v35  ;;  %v776_v39 = vadd.f32 1.0, %v1074_v37 }
 0x25f   :  { %v792_v40 = vmul.f32 %v776_v39, %v728_v38 }
 0x260   :  { %v1076_v21 = vpop.eup %1075 }
 0x261   :  { %808 = vst [vmem:[#allocation9 + $0x68] sm:$0xff] %v792_v40  ;;  %v777_v42 = vadd.f32 1.0, %v1076_v21 }
 0x263   :  { %v793_v43 = vmul.f32 %v777_v42, %v729_v41 }
 0x264   :  { %v1078_v44 = vpop.eup %1077 }
 0x265   :  { %809 = vst [vmem:[#allocation9 + $0x70] sm:$0xff] %v793_v43  ;;  %v778_v45 = vadd.f32 1.0, %v1078_v44 }
 0x267   :  { %v794_v46 = vmul.f32 %v778_v45, %v730_v31 }
 0x269   :  { %810 = vst [vmem:[#allocation9 + $0x78] sm:$0xff] %v794_v46 }
 0x26a   :  { %1156 = shalt.err (!%p1153_p0)
}
 0x26b   :  { %s1157_s12 = scalar_lea.hbm %s1430_s5, 2048 }
 0x26c   :  { %p1158_p1 = scmp.ne.s32.totalorder %s1430_s5, %s1157_s12  ;;  %p1161_p2 = scmp.lt.u32.totalorder %s1157_s12, %s1430_s5 }
 0x26e   :  { %p1163_p3 = pnand %p1161_p2, %p1158_p1 }
 0x270   :  { %1166 = shalt.err (!%p1163_p3)
}
 0x271   :  { %822 = dma.vmem_to_hbm [thread:$0]  %s817_s8, 2048, %s1430_s5, [#allocation5], %s1177_s1, %s1177_s1, %s1178_s17  }
 0x272   :  { %1171 = dma.done.wait [#allocation5], 2048  }
 0x273   :  { %1172 = vsyncadd [#allocation5], 4294965248 }
 0x274   :  { %826 = vsyncpa [#allocation4], 1 }
 0x275   :  { %827 = vsyncpa [#allocation7], 1 }
 0x276   :  { %828 = vsyncpa [#allocation5], 1 }

</bundles_post_ra>
